<compile_context>
chip_gen: v5e
topology: v5e:2x2
jax: 0.10.0
libtpu: 0.0.40
codegen_flags: <defaults>
</compile_context>

<pallas_src>
import jax
import jax.numpy as jnp
from jax.experimental import pallas as pl
from jax.experimental.pallas import tpu as pltpu


def _one_hot_kernel(x_ref, o_ref):
    # x_ref: (tile_rows, 1) int32      o_ref: (tile_rows, tn_block) out_dtype
    tn = o_ref.shape[1]
    col0 = pl.program_id(1) * tn                       # vocab offset of this lane block
    # (1, tn) iota row; the broadcast happens inside the compare, so we never
    # materialise a full (rows, tn) int32 iota stream.
    ids = col0 + jax.lax.broadcasted_iota(jnp.int32, (1, tn), 1)
    o_ref[...] = (x_ref[...] == ids).astype(o_ref.dtype)


def one_hot(x, n_tokens: int, *, out_dtype=jnp.uint8, tile_rows=None,
            tn_block=None, min_pallas_bytes=256 * 1024):
    """Pallas equivalent of torch.nn.functional.one_hot(x, n_tokens).

    Returns shape (*x.shape, n_tokens) with 0/1 values in `out_dtype`.
    Out-of-range / negative indices yield an all-zero row (PyTorch raises).
    """
    orig_shape = x.shape
    itemsize = jnp.dtype(out_dtype).itemsize
    n = 1
    for d in orig_shape:
        n *= int(d)
    total_out_bytes = n * n_tokens * itemsize

    # ---- Small-problem fast path: a pallas_call launch + pipeline prologue is
    # pure overhead below a few hundred KiB of output.
    if total_out_bytes < min_pallas_bytes:
        return jax.nn.one_hot(x, n_tokens, dtype=out_dtype)

    x_flat = x.reshape(-1, 1).astype(jnp.int32)

    budget_bytes = 8 * 1024 * 1024  # per output block (double-buffered by Pallas)

    # ---- Vocab (lane) tiling: prefer a single full-width block; otherwise the
    # widest 128-multiple divisor of n_tokens up to 4096 lanes.
    if tn_block is None:
        if n_tokens % 128 != 0 or 32 * n_tokens * itemsize <= budget_bytes:
            tn_block = n_tokens
        else:
            tn_block = 128
            for cand in range(min(4096, n_tokens), 127, -128):
                if n_tokens % cand == 0:
                    tn_block = cand
                    break
    assert n_tokens % tn_block == 0, "tn_block must divide n_tokens"
    assert tn_block == n_tokens or tn_block % 128 == 0, (
        "tn_block must be a multiple of 128 or equal to n_tokens")
    n_tn = n_tokens // tn_block

    # ---- Row (sublane) tiling: budget ~8 MiB of output per block, but cap the
    # row count so the lane-padded (tile_rows, 1) index block stays small
    # (2048 rows -> 1 MiB/buffer), and keep >= 4 row blocks on non-trivial
    # problems so v7x's two TensorCores both get work.
    MAX_TILE_ROWS = 2048
    if tile_rows is None:
        tile_rows = max(32, min(MAX_TILE_ROWS, budget_bytes // (tn_block * itemsize)))
        if total_out_bytes > 2 * 1024 * 1024:
            target = ((pl.cdiv(n, 4) + 31) // 32) * 32
            tile_rows = min(tile_rows, max(32, target))
    if tile_rows >= n:
        tile_rows = n              # single full-extent row block (always legal)
    else:
        tile_rows = max(32, (tile_rows // 32) * 32)  # sublane-packing friendly

    grid = (pl.cdiv(n, tile_rows), n_tn)  # rows outermost, vocab inner

    # Actual double-buffered VMEM footprint (+ slack); capped so it is safe on
    # v7x (64 MiB physical) and raises the 16/32 MiB scoped defaults elsewhere.
    vmem_needed = 2 * tile_rows * tn_block * itemsize + 2 * tile_rows * 128 * 4
    vmem_limit = int(min(48 * 1024 * 1024,
                         max(32 * 1024 * 1024, vmem_needed + (4 << 20))))

    cost = pl.CostEstimate(flops=n * n_tokens, transcendentals=0,
                           bytes_accessed=total_out_bytes + 4 * n)

    out = pl.pallas_call(
        _one_hot_kernel,
        out_shape=jax.ShapeDtypeStruct((n, n_tokens), out_dtype),
        grid_spec=pltpu.PrefetchScalarGridSpec(
            num_scalar_prefetch=0,
            grid=grid,
            # Index block is constant across the vocab axis -> fetched once per
            # row tile (Pallas skips the DMA when the block index is unchanged).
            in_specs=[pl.BlockSpec((tile_rows, 1), lambda i, j: (i, 0))],
            out_specs=pl.BlockSpec((tile_rows, tn_block), lambda i, j: (i, j)),
        ),
        compiler_params=pltpu.CompilerParams(
            dimension_semantics=("parallel", "parallel"),
            vmem_limit_bytes=vmem_limit,
        ),
        cost_estimate=cost,
    )(x_flat)

    return out.reshape(*orig_shape, n_tokens)


if __name__ == "__main__":
    key = jax.random.PRNGKey(0)
    k0, k1, k2 = jax.random.split(key, 3)

    # 1) Tiny shape implied by the module (batch, seq) tokens: default path
    #    takes the small-problem fallback.
    n_tokens = 32
    x = jax.random.randint(k0, (2, 8), minval=0, maxval=n_tokens, dtype=jnp.int32)
    ref = jax.nn.one_hot(x, n_tokens, dtype=jnp.uint8)
    y = jax.block_until_ready(one_hot(x, n_tokens))
    assert y.shape == (2, 8, n_tokens), y.shape
    assert jnp.array_equal(y, ref), "mismatch (fallback path)"

    # 2) Same tiny shape forced through the Pallas kernel (single full block).
    y_k = jax.block_until_ready(one_hot(x, n_tokens, min_pallas_bytes=0))
    assert jnp.array_equal(y_k, ref), "mismatch (pallas single-block path)"

    # 3) Uneven rows + explicit row tiling + int32 output: exercises the masked
    #    partial last row block.
    n_tokens2 = 128
    x2 = jax.random.randint(k1, (3, 33), minval=0, maxval=n_tokens2, dtype=jnp.int32)
    y2 = jax.block_until_ready(
        one_hot(x2, n_tokens2, out_dtype=jnp.int32, tile_rows=64, min_pallas_bytes=0))
    ref2 = jax.nn.one_hot(x2, n_tokens2, dtype=jnp.int32)
    assert y2.shape == (3, 33, n_tokens2), y2.shape
    assert jnp.array_equal(y2, ref2), "mismatch (masked-tail path)"

    # 4) Two-axis grid: vocab split into 128-wide lane blocks.
    n_tokens3 = 256
    x3 = jax.random.randint(k2, (2, 40), minval=0, maxval=n_tokens3, dtype=jnp.int32)
    y3 = jax.block_until_ready(
        one_hot(x3, n_tokens3, tile_rows=32, tn_block=128, min_pallas_bytes=0))
    ref3 = jax.nn.one_hot(x3, n_tokens3, dtype=jnp.uint8)
    assert y3.shape == (2, 40, n_tokens3), y3.shape
    assert jnp.array_equal(y3, ref3), "mismatch (two-axis grid path)"

    print("KERNEL_OK")
</pallas_src>

<mosaic_0001>
module attributes {stable_mosaic.version = 11 : i64} {
  func.func @_one_hot_kernel(%arg0: i32, %arg1: i32, %arg2: memref<16x1xi32, #tpu.memory_space<vmem>>, %arg3: memref<16x32xi8, #tpu.memory_space<vmem>>) attributes {dimension_semantics = [#tpu.dimension_semantics<parallel>, #tpu.dimension_semantics<parallel>], iteration_bounds = array<i64: 1, 1>, scalar_prefetch = 0 : i64, scratch_operands = 0 : i64, tpu.core_type = #tpu.core_type<tc>, window_params = [{transform_indices = @transform_0, window_bounds = array<i64: 16, 1>}, {transform_indices = @transform_1, window_bounds = array<i64: 16, 32>}]} {
    %c32_i32 = arith.constant 32 : i32
    %0 = arith.muli %arg1, %c32_i32 : i32
    %1 = tpu.iota {dimensions = array<i32: 1>} : vector<1x32xi32>
    %2 = vector.broadcast %0 : i32 to vector<1x32xi32>
    %3 = arith.addi %2, %1 : vector<1x32xi32>
    %c0 = arith.constant 0 : index
    %c0_0 = arith.constant 0 : index
    %4 = vector.load %arg2[%c0, %c0_0] : memref<16x1xi32, #tpu.memory_space<vmem>>, vector<16x1xi32>
    %5 = vector.broadcast %4 : vector<16x1xi32> to vector<16x32xi32>
    %6 = vector.broadcast %3 : vector<1x32xi32> to vector<16x32xi32>
    %7 = arith.cmpi eq, %5, %6 : vector<16x32xi32>
    %8 = arith.extui %7 : vector<16x32xi1> to vector<16x32xi8>
    %c0_1 = arith.constant 0 : index
    %c0_2 = arith.constant 0 : index
    %9 = vector.load %arg3[%c0_1, %c0_2] : memref<16x32xi8, #tpu.memory_space<vmem>>, vector<16x32xi8>
    tpu.vector_store %arg3[%c0_1, %c0_2], %8 {strides = array<i32>} : memref<16x32xi8, #tpu.memory_space<vmem>>, vector<16x32xi8>,
    return
  }
  func.func @transform_0(%arg0: i32, %arg1: i32) -> (i32, i32) {
    %c0_i32 = arith.constant 0 : i32
    %c0_i32_0 = arith.constant 0 : i32
    return %arg0, %c0_i32 : i32, i32
  }
  func.func @transform_1(%arg0: i32, %arg1: i32) -> (i32, i32) {
    %c0_i32 = arith.constant 0 : i32
    return %arg0, %arg1 : i32, i32
  }
}

</mosaic_0001>

<bundles_post_ra>
// kernel: tpu_custom_call.1
= control target key start
LH: loop header
LB: loop body
LE: loop exit
PB: predicated region body
PF: predicated region fallthrough
CT: control target
= control target key end

     0   :  { %s113_s0 = inlined_call_operand.vmem [shape: s32[16,1], index: 0, kind: input, shape index: {}]   ;;  %s114_s1 = inlined_call_operand.hbm [shape: u8[16,32], index: 1, kind: output, shape index: {}]  }
   0x1   :  { %v16_v0 = vld [vmem:[%s113_s0] sm:$0xff] }
   0x2   :  { %6 = vsyncpa [#allocation3], 0  ;;  %v90_v1 = vmov 0   ;;  %v17_v2 = vld [vmem:[%s113_s0 + $0x8] sm:$0xff]  ;;  %v12_v4 = vlaneseq  ;;  %s91_s10 = smov [#allocation2]   ;;  %s47_s0 = sshll.u32 %s114_s1, 4  ;;  %s48_s0 = int_to_ptr.hbm [resolvable:$true] %s47_s0 }
   0x3   :  { %63 = vset.pattern.permute.xlu0 %v90_v1  ;;  %s45_s11 = sshll.u32 %s91_s10, 4  ;;  %vm38_vm4 = vcmask 254976   ;;  %s92_s14 = smov 32   ;;  %s46_s11 = int_to_ptr.vmem [resolvable:$true] %s45_s11 }
   0x4   :  { %19 = vperm.xlu0 %63, %v16_v0   ;;  %v13_v5 = vand.u32 127, %v12_v4  ;;  %s93_s15 = smov 2  }
   0xc   :  { %22 = vperm.xlu0 %63, %v17_v2  }
  0x76   :  { %v20_v3 = vpop.permute.xlu0 %19 }
  0x77   :  { %vm24_vm0 = vcmp.eq.s32.totalorder %v20_v3, %v13_v5 }
  0x7e   :  { %v23_v6 = vpop.permute.xlu0 %22 }
  0x7f   :  { %vm25_vm1 = vcmp.eq.s32.totalorder %v23_v6, %v13_v5 }
  0x80   :  { %vm26_vm2 = vmpackc.low %vm25_vm1, %vm24_vm0 }
  0x81   :  { %v27_v7 = vsel %vm26_vm2, 16711935, %v90_v1 }
  0x82   :  { %v29_v8 = vpack.c.b8 %v27_v7, %v27_v7 }
  0x84   :  { %vm30_vm3 = vnez %v29_v8 }
  0x85   :  { %v31_v9 = vsel %vm30_vm3, 16843009, %v90_v1 }
  0x86   :  { %v32_v10 = vunpack.c.0.s8 %v31_v9  ;;  %v33_v11 = vunpack.c.1.s8 %v31_v9 }
  0x88   :  { %v34_v12 = vpack.c.b16 %v32_v10, %v32_v10  ;;  %v36_v13 = vpack.c.b16 %v33_v11, %v33_v11 }
  0x8a   :  { %v35_v14 = vpack.c.b8 %v34_v12, %v34_v12  ;;  %v37_v15 = vpack.c.b8 %v36_v13, %v36_v13 }
  0x8c   :  { %39 = vst.msk [vmem:[#allocation2] sm:$0x3] %vm38_vm4, %v35_v14 }
  0x8d   :  { %40 = vst.msk [vmem:[#allocation2 + $0x2] sm:$0x3] %vm38_vm4, %v37_v15 }
  0x8e   :  { %53 = dma.vmem_to_hbm [thread:$0]  %s46_s11, 64, %s48_s0, [#allocation3], %s92_s14, %s92_s14, %s93_s15  }
  0x8f   :  { %88 = dma.done.wait [#allocation3], 64  }
  0x90   :  { %89 = vsyncadd [#allocation3], 4294967232 }
  0x91   :  { %58 = vsyncpa [#allocation3], 1 }

</bundles_post_ra>
